<compile_context>
chip_gen: v7x
topology: tpu7x:2x2x1
jax: 0.10.0
libtpu: 0.0.40
codegen_flags: <defaults>
</compile_context>

<pallas_src>
import jax
import jax.numpy as jnp
from jax.experimental import pallas as pl
from jax.experimental.pallas import tpu as pltpu


def masked_avg_pool_kernel(emb_ref, mask_ref, inv_ref, out_ref):
    # emb_ref:  (TB, S, H) bf16 (or f32) tile for TB batch rows
    # mask_ref: (TB, S, 1) f32 tile (sublane-varying, lane-broadcast)
    # inv_ref:  (TB, 1)    f32 tile: 1 / clamp(sum(mask), 1e-9) per row
    # out_ref:  (TB, H)    f32 tile (lane-dense)
    emb = emb_ref[...].astype(jnp.float32)        # f32 accumulate (v5e-safe)
    masked = emb * mask_ref[...]                  # VPU, mask broadcast over lanes
    sum_emb = jnp.sum(masked, axis=1)             # (TB, H) sublane reduce (XLU)
    out_ref[...] = sum_emb * inv_ref[...]         # (TB, 1) broadcast over H


def _choose_block_b(B, S, H, emb_bytes):
    """Pick TB rows/step so double-buffered tiles stay well under scoped VMEM
    on every generation (v7x: 32 MiB scoped default of 64 MiB physical)."""
    budget = 8 * 1024 * 1024                      # per double-buffered input set
    per_row = S * H * emb_bytes + S * 4           # emb row (native dtype) + mask row
    tb = max(1, budget // (2 * per_row))
    if tb >= B:
        return B                                  # one block covers the batch
    tb = max(8, (tb // 8) * 8)                    # sublane-aligned (TB, H) out block
    while tb > 8 and B % tb:
        tb -= 8
    return tb if B % tb == 0 else B


def masked_average_pool(token_embeddings, attention_mask, *, block_b=None):
    """token_embeddings: [B, S, H] (bf16 or f32); attention_mask: [B, S] numeric."""
    B, S, H = token_embeddings.shape
    # attention_mask.unsqueeze(-1).float()
    mask = attention_mask.astype(jnp.float32).reshape(B, S, 1)
    # Per-row 1 / torch.clamp(sum(mask), min=1e-9), exact f32, tiny XLA op.
    inv_denom = 1.0 / jnp.maximum(jnp.sum(mask, axis=1), 1e-9)      # (B, 1)

    if block_b is None:
        block_b = _choose_block_b(B, S, H, token_embeddings.dtype.itemsize)
    assert B % block_b == 0, "block_b must divide the batch"
    grid = (B // block_b,)

    # TODO(synk): for very long sequences add a second "arbitrary" grid axis
    #             over S with a VMEM accumulator; single-S-block is fine here.
    return pl.pallas_call(
        masked_avg_pool_kernel,
        out_shape=jax.ShapeDtypeStruct((B, H), jnp.float32),
        grid_spec=pltpu.PrefetchScalarGridSpec(
            num_scalar_prefetch=0,
            grid=grid,
            in_specs=[
                pl.BlockSpec((block_b, S, H), lambda b: (b, 0, 0)),   # embeddings (bf16)
                pl.BlockSpec((block_b, S, 1), lambda b: (b, 0, 0)),   # mask column
                pl.BlockSpec((block_b, 1), lambda b: (b, 0)),         # 1/denominator
            ],
            out_specs=pl.BlockSpec((block_b, H), lambda b: (b, 0)),   # lane-dense
        ),
        compiler_params=pltpu.CompilerParams(
            dimension_semantics=("parallel",),
            vmem_limit_bytes=64 * 1024 * 1024,
        ),
    )(token_embeddings, mask, inv_denom)


def synthetic_bert_encoder(input_ids, token_type_ids, vocab_size, hidden, key):
    """Deterministic stand-in producing token_embeddings [B, S, H] (plain JAX glue)."""
    k_emb, k_type, k_mix = jax.random.split(key, 3)
    word_emb = jax.random.normal(k_emb, (vocab_size, hidden), jnp.float32) * 0.02
    type_emb = jax.random.normal(k_type, (2, hidden), jnp.float32) * 0.02
    mix = jax.random.normal(k_mix, (hidden, hidden), jnp.float32) * (hidden ** -0.5)
    x = jnp.take(word_emb, input_ids, axis=0) + jnp.take(type_emb, token_type_ids, axis=0)
    x = jnp.tanh(x @ mix)
    return x.astype(jnp.bfloat16)   # feed the kernel native bf16 activations


def reference_pool(token_embeddings, attention_mask):
    emb = token_embeddings.astype(jnp.float32)
    mask = attention_mask.astype(jnp.float32)[..., None]
    s = jnp.sum(emb * mask, axis=1)
    m = jnp.maximum(jnp.sum(mask, axis=1), 1e-9)   # torch.clamp(min=1e-9)
    return s / m


if __name__ == "__main__":
    B, S, H, VOCAB = 16, 16, 128, 512
    key = jax.random.PRNGKey(0)
    k_ids, k_model = jax.random.split(key, 2)

    input_ids = jax.random.randint(k_ids, (B, S), 0, VOCAB, dtype=jnp.int32)
    token_type_ids = jnp.zeros((B, S), dtype=jnp.int32)
    # variable-length attention masks (1..S real tokens per row, rest padding)
    lengths = (jnp.arange(B, dtype=jnp.int32) % S) + 1
    attention_mask = (jnp.arange(S)[None, :] < lengths[:, None]).astype(jnp.int32)

    token_embeddings = synthetic_bert_encoder(
        input_ids, token_type_ids, VOCAB, H, k_model)          # [B, S, H] bf16

    # block_b=8 -> grid of 2 parallel steps (exercises tiling + both TCs on v7x)
    pooled = masked_average_pool(token_embeddings, attention_mask, block_b=8)
    pooled = jax.block_until_ready(pooled)

    ref = reference_pool(token_embeddings, attention_mask)
    assert pooled.shape == (B, H)
    assert jnp.allclose(pooled, ref, atol=1e-4, rtol=1e-4), float(
        jnp.max(jnp.abs(pooled - ref)))

    print("KERNEL_OK")
</pallas_src>

<mosaic_0001>
module attributes {stable_mosaic.version = 11 : i64} {
  func.func @masked_avg_pool_kernel(%arg0: i32, %arg1: memref<8x16x128xbf16, #tpu.memory_space<vmem>>, %arg2: memref<8x16x1xf32, #tpu.memory_space<vmem>>, %arg3: memref<8x1xf32, #tpu.memory_space<vmem>>, %arg4: memref<8x128xf32, #tpu.memory_space<vmem>>) attributes {dimension_semantics = [#tpu.dimension_semantics<parallel>], iteration_bounds = array<i64: 2>, scalar_prefetch = 0 : i64, scratch_operands = 0 : i64, tpu.core_type = #tpu.core_type<tc>, window_params = [{transform_indices = @transform_0, window_bounds = array<i64: 8, 16, 128>}, {transform_indices = @transform_1, window_bounds = array<i64: 8, 16, 1>}, {transform_indices = @transform_2, window_bounds = array<i64: 8, 1>}, {transform_indices = @transform_3, window_bounds = array<i64: 8, 128>}]} {
    %c0 = arith.constant 0 : index
    %c0_0 = arith.constant 0 : index
    %c0_1 = arith.constant 0 : index
    %0 = vector.load %arg1[%c0, %c0_0, %c0_1] : memref<8x16x128xbf16, #tpu.memory_space<vmem>>, vector<8x16x128xbf16>
    %1 = arith.extf %0 : vector<8x16x128xbf16> to vector<8x16x128xf32>
    %c0_2 = arith.constant 0 : index
    %c0_3 = arith.constant 0 : index
    %c0_4 = arith.constant 0 : index
    %2 = vector.load %arg2[%c0_2, %c0_3, %c0_4] : memref<8x16x1xf32, #tpu.memory_space<vmem>>, vector<8x16x1xf32>
    %3 = vector.broadcast %2 : vector<8x16x1xf32> to vector<8x16x128xf32>
    %4 = arith.mulf %1, %3 : vector<8x16x128xf32>
    %cst = arith.constant dense<0.000000e+00> : vector<8x128xf32>
    %5 = vector.multi_reduction <add>, %4, %cst [1] : vector<8x16x128xf32> to vector<8x128xf32>
    %c0_5 = arith.constant 0 : index
    %c0_6 = arith.constant 0 : index
    %6 = vector.load %arg3[%c0_5, %c0_6] : memref<8x1xf32, #tpu.memory_space<vmem>>, vector<8x1xf32>
    %7 = vector.broadcast %6 : vector<8x1xf32> to vector<8x128xf32>
    %8 = arith.mulf %5, %7 : vector<8x128xf32>
    %c0_7 = arith.constant 0 : index
    %c0_8 = arith.constant 0 : index
    %9 = vector.load %arg4[%c0_7, %c0_8] : memref<8x128xf32, #tpu.memory_space<vmem>>, vector<8x128xf32>
    tpu.vector_store %arg4[%c0_7, %c0_8], %8 {strides = array<i32>} : memref<8x128xf32, #tpu.memory_space<vmem>>, vector<8x128xf32>,
    return
  }
  func.func @transform_0(%arg0: i32) -> (i32, i32, i32) {
    %c0_i32 = arith.constant 0 : i32
    %c0_i32_0 = arith.constant 0 : i32
    %c0_i32_1 = arith.constant 0 : i32
    return %arg0, %c0_i32, %c0_i32_0 : i32, i32, i32
  }
  func.func @transform_1(%arg0: i32) -> (i32, i32, i32) {
    %c0_i32 = arith.constant 0 : i32
    %c0_i32_0 = arith.constant 0 : i32
    %c0_i32_1 = arith.constant 0 : i32
    return %arg0, %c0_i32, %c0_i32_0 : i32, i32, i32
  }
  func.func @transform_2(%arg0: i32) -> (i32, i32) {
    %c0_i32 = arith.constant 0 : i32
    %c0_i32_0 = arith.constant 0 : i32
    return %arg0, %c0_i32 : i32, i32
  }
  func.func @transform_3(%arg0: i32) -> (i32, i32) {
    %c0_i32 = arith.constant 0 : i32
    %c0_i32_0 = arith.constant 0 : i32
    return %arg0, %c0_i32 : i32, i32
  }
}

</mosaic_0001>

<bundles_post_ra>
// kernel: tpu_custom_call.1
= control target key start
LH: loop header
LB: loop body
LE: loop exit
PB: predicated region body
PF: predicated region fallthrough
CT: control target
= control target key end

     0   :  { %s1241_s0 = inlined_call_operand.hbm [shape: bf16[16,16,128], index: 0, kind: input, shape index: {}]   ;;  %s1242_s1 = inlined_call_operand.hbm [shape: f32[16,16,1], index: 1, kind: input, shape index: {}]   ;;  %s1243_s2 = inlined_call_operand.hbm [shape: f32[16,1], index: 2, kind: input, shape index: {}]   ;;  %s1244_s3 = inlined_call_operand.hbm [shape: f32[16,128], index: 3, kind: output, shape index: {}]  }
   0x1   :  { %1248 = sst [smem:[#allocation12_spill]] %s1241_s0 }
   0x2   :  { %8 = vsyncpa [#allocation3], 0 }
   0x3   :  { %10 = vsyncpa [#allocation3 + $0x1], 0 }
   0x4   :  { %11 = vsyncpa [#allocation6], 0 }
   0x5   :  { %13 = vsyncpa [#allocation6 + $0x1], 0 }
   0x6   :  { %14 = vsyncpa [#allocation4], 0 }
   0x7   :  { %16 = vsyncpa [#allocation4 + $0x1], 0  ;;  %s972_s12 = smov 0   ;;  %s974_s13 = smov 0  }
   0x8   :  { %s976_s14 = smov 0   ;;  %s978_s15 = smov 0  }
   0x9 LB: > { %s993_s16 = sadd.s32 4294967295, %s941_s15   ;;  %s653_s17 = sadd.s32 4294967294, %s941_s15   ;;  %s941_s15 = sphi %s978_s15, %s1266_s15   ;;  %s937_s14 = sphi %s976_s14, %s1265_s14   ;;  %s933_s13 = sphi %s974_s13, %s1264_s13   ;;  %s929_s12 = sphi %s972_s12, %s1263_s12  }
   0xa   : > { %s997_s18 = sadd.s32 1, %s941_s15   ;;  %s29_s19 = sadd.s32 1, %s937_s14 }
   0xb   : > { %s26_s20 = ssub.s32 %s941_s15, %s997_s18  ;;  %p36_p0 = scmp.ne.s32.totalorder %s937_s14, %s933_s13 }
   0xc   : > { %p27_p1 = scmp.eq.s32.totalorder %s26_s20, 0  ;;  %p37_p2 = scmp.eq.s32.totalorder %s941_s15, 0 }
   0xd   : > { %p42_p3 = scmp.ne.s32.totalorder %s933_s13, %s929_s12  ;;  %p43_p4 = scmp.eq.s32.totalorder %s993_s16, 0 }
   0xe   : > { %s1009_s21 = scalar_select %p27_p1, %s937_s14, %s29_s19  }
   0xf   : > { %p38_p5 = por %p37_p2, %p36_p0  ;;  %p1011_p6 = por %p43_p4, %p42_p3 }
  0x10   : > { %p118_p7 = scmp.eq.s32.totalorder %s993_s16, 1  ;;  %p124_p8 = scmp.eq.s32.totalorder %s653_s17, 1 }
  0x11   : > { %s1249_s22 = scalar_select %p1011_p6, 1, 0 }
  0x12   : > { %p740_p10 = scmp.lt.s32.totalorder %s941_s15, 2  ;;  %p1018_p11 = por %p118_p7, %p36_p0 }
  0x13   : > { %p1022_p12 = por %p124_p8, %p42_p3  ;;  %s1027_s25 = sand.u32 1, %s937_s14  }
  0x14   : > { %s1250_s23 = scalar_select %p1018_p11, 1, 0 }
  0x15   : > { %s1251_s24 = scalar_select %p1022_p12, 1, 0 }
  0x16   : > { %p1029_p13 = pnand %p740_p10, %p38_p5  ;;  %s166_s27 = sand.u32 1, %s941_s15  }
  0x17   : > { %s660_s28 = sshll.u32 %s1027_s25, 7  ;;  %s678_s29 = sshll.u32 %s941_s15, 11 }
  0x18   : > { %s1252_s26 = scalar_select %p1029_p13, 1, 0 }
  0x19   : > { %s1039_s5 = scalar_lea.hbm %s1242_s1, %s678_s29  ;;  %s170_s6 = scalar_lea.vmem [#allocation5], %s660_s28 }
  0x1a   : > { %s178_s7 = sshll.u32 %s170_s6, 4  ;;  %s1044_s8 = scalar_lea.sflag [#allocation6], %s166_s27  ;;  %s1041_s7 = int_to_ptr.vmem [resolvable:$true] %s178_s7 }
  0x1b   : > { %s781_s9 = scalar_lea.hbm %s1039_s5, 2048  ;;  %p1050_p2 = pneg %p1029_p13 }
  0x1c   : > { %p782_p1 = scmp.ne.s32.totalorder %s1039_s5, %s781_s9  ;;  %s786_s19 = scalar_lea.hbm %s1242_s1, 4096 }
  0x1d   : > { %p787_p5 = scmp.lt.u32.totalorder %s1039_s5, %s1242_s1  ;;  %p788_p7 = scmp.lt.u32.totalorder %s786_s19, %s781_s9 }
  0x1e   : > { %p784_p3 = pnand %p1050_p2, %p782_p1  ;;  %p790_p10 = scmp.lt.u32.totalorder %s781_s9, %s1039_s5 }
  0x1f   : > { %p789_p8 = por %p788_p7, %p787_p5 }
  0x20   : > { %p785_p4 = pneg %p784_p3 }
  0x21   : > { %p791_p9 = por %p790_p10, %p789_p8 }
  0x23   : > { %p792_p0 = pnand %p791_p9, %p785_p4 }
  0x25   : > { %795 = shalt.err (!%p792_p0)
}
  0x26   : > { %s796_s27 = scalar_lea.vmem %s1041_s7, 2048  ;;  %s943_s29 = smov [#allocation5]  }
  0x27   : > { %p797_p1 = scmp.ne.s32.totalorder %s1041_s7, %s796_s27  ;;  %s801_s30 = sshll.u32 %s943_s29, 4  ;;  %s802_s30 = int_to_ptr.vmem [resolvable:$false] %s801_s30 }
  0x28   : > { %s803_s4 = scalar_lea.vmem %s802_s30, 4096  ;;  %p804_p11 = scmp.lt.s32.totalorder %s1041_s7, %s802_s30 }
  0x29   : > { %p799_p3 = pnand %p797_p1, %p1050_p2  ;;  %p805_p6 = scmp.lt.s32.totalorder %s803_s4, %s796_s27 }
  0x2b   : > { %p800_p12 = pneg %p799_p3  ;;  %p806_p5 = por %p805_p6, %p804_p11 }
  0x2d   : > { %p807_p7 = pnand %p806_p5, %p800_p12 }
  0x2f   : > { %810 = shalt.err (!%p807_p7)
}
  0x30   : > { %s944_s6 = smov 128   ;;  %s945_s9 = smov 8  }
  0x31   : > { %732 = dma.hbm_to_vmem [thread:$0]  (!%p1029_p13), %s1039_s5, 2048, %s1041_s7, %s1044_s8, %s944_s6, %s944_s6, %s945_s9  }
  0x32   : > { %p204_p9 = scmp.lt.s32.totalorder %s941_s15, 3  ;;  %s656_s11 = sshll.u32 %s1027_s25, 6 }
  0x33   : > { %s676_s17 = sshll.u32 %s941_s15, 10  ;;  %p1254_p6 = scmp.ge.s32.totalorder %s941_s15, 1 }
  0x34   : > { %s1256_s0 = sld [smem:[#allocation12_spill]]  ;;  %s148_s29 = scalar_lea.vmem [#allocation2], %s656_s11 }
  0x35   : > { %p1079_p11 = pnand %p1254_p6, %p204_p9  ;;  %s156_s30 = sshll.u32 %s148_s29, 4  ;;  %s1088_s30 = int_to_ptr.vmem [resolvable:$true] %s156_s30 }
  0x36   : > { %s664_s5 = sshll.u32 %s1027_s25, 3  ;;  %s145_s7 = scalar_lea.sflag [#allocation3], %s1027_s25 }
  0x37   : > { %s1255_s19 = scalar_select %p1079_p11, 1, 0 }
  0x3a   : > { %s1086_s27 = scalar_lea.hbm %s1256_s0, %s676_s17  ;;  %s816_s17 = scalar_lea.hbm %s1256_s0, 2048 }
  0x3b   : > { %s811_s4 = scalar_lea.hbm %s1086_s27, 1024  ;;  %p817_p8 = scmp.lt.u32.totalorder %s1086_s27, %s1256_s0 }
  0x3c   : > { %p812_p12 = scmp.ne.s32.totalorder %s1086_s27, %s811_s4  ;;  %p818_p10 = scmp.lt.u32.totalorder %s816_s17, %s811_s4 }
  0x3d   : > { %p820_p3 = scmp.lt.u32.totalorder %s811_s4, %s1086_s27 }
  0x3e   : > { %p814_p0 = pnand %p812_p12, %p1050_p2  ;;  %p819_p1 = por %p818_p10, %p817_p8 }
  0x40   : > { %p815_p4 = pneg %p814_p0  ;;  %p821_p5 = por %p820_p3, %p819_p1 }
  0x42   : > { %p822_p7 = pnand %p821_p5, %p815_p4 }
  0x44   : > { %825 = shalt.err (!%p822_p7)
}
  0x45   : > { %s826_s11 = scalar_lea.vmem %s1088_s30, 1024  ;;  %s946_s29 = smov [#allocation2]  }
  0x46   : > { %p827_p9 = scmp.ne.s32.totalorder %s1088_s30, %s826_s11  ;;  %s831_s6 = sshll.u32 %s946_s29, 4  ;;  %s832_s6 = int_to_ptr.vmem [resolvable:$false] %s831_s6 }
  0x47   : > { %s833_s9 = scalar_lea.vmem %s832_s6, 2048  ;;  %p834_p0 = scmp.lt.s32.totalorder %s1088_s30, %s832_s6 }
  0x48   : > { %p829_p6 = pnand %p827_p9, %p1050_p2  ;;  %p835_p11 = scmp.lt.s32.totalorder %s833_s9, %s826_s11 }
  0x4a   : > { %p830_p12 = pneg %p829_p6  ;;  %p836_p8 = por %p835_p11, %p834_p0 }
  0x4c   : > { %p837_p10 = pnand %p836_p8, %p830_p12 }
  0x4e   : > { %840 = shalt.err (!%p837_p10)
}
  0x4f   : > { %s947_s4 = smov 64   ;;  %s948_s17 = smov 4  }
  0x50   : > { %729 = dma.hbm_to_vmem [thread:$0]  (!%p1029_p13), %s1086_s27, 1024, %s1088_s30, %s145_s7, %s947_s4, %s947_s4, %s948_s17  }
  0x51   : > { %s665_s20 = sshll.u32 %s941_s15, 7  ;;  %s192_s6 = scalar_lea.vmem [#allocation7], %s664_s5 }
  0x52   : > { %s1119_s11 = scalar_lea.hbm %s1243_s2, %s665_s20  ;;  %s199_s9 = sshll.u32 %s192_s6, 4  ;;  %s200_s9 = int_to_ptr.vmem [resolvable:$true] %s199_s9 }
  0x53   : > { %s841_s0 = scalar_lea.hbm %s1119_s11, 128  ;;  %s846_s7 = scalar_lea.hbm %s1243_s2, 256 }
  0x54   : > { %p842_p11 = scmp.ne.s32.totalorder %s1119_s11, %s841_s0  ;;  %p847_p3 = scmp.lt.u32.totalorder %s1119_s11, %s1243_s2 }
  0x55   : > { %p848_p5 = scmp.lt.u32.totalorder %s846_s7, %s841_s0  ;;  %p850_p9 = scmp.lt.u32.totalorder %s841_s0, %s1119_s11 }
  0x56   : > { %p844_p4 = pnand %p842_p11, %p1050_p2 }
  0x57   : > { %p849_p7 = por %p848_p5, %p847_p3 }
  0x58   : > { %p845_p1 = pneg %p844_p4 }
  0x59   : > { %p851_p6 = por %p850_p9, %p849_p7 }
  0x5b   : > { %p852_p12 = pnand %p851_p6, %p845_p1 }
  0x5d   : > { %855 = shalt.err (!%p852_p12)
}
  0x5e   : > { %s856_s25 = scalar_lea.vmem %s200_s9, 128  ;;  %s949_s5 = smov [#allocation7]  }
  0x5f   : > { %p857_p0 = scmp.ne.s32.totalorder %s200_s9, %s856_s25  ;;  %s861_s20 = sshll.u32 %s949_s5, 4  ;;  %s862_s20 = int_to_ptr.vmem [resolvable:$false] %s861_s20 }
  0x60   : > { %s863_s28 = scalar_lea.vmem %s862_s20, 256  ;;  %p864_p11 = scmp.lt.s32.totalorder %s200_s9, %s862_s20 }
  0x61   : > { %p859_p8 = pnand %p857_p0, %p1050_p2  ;;  %p865_p4 = scmp.lt.s32.totalorder %s863_s28, %s856_s25 }
  0x63   : > { %p860_p10 = pneg %p859_p8  ;;  %p866_p13 = por %p865_p4, %p864_p11 }
  0x65   : > { %p867_p3 = pnand %p866_p13, %p860_p10 }
  0x67   : > { %870 = shalt.err (!%p867_p3)
}
  0x68   : > { %p1257_p5 = scmp.ne.s32.totalorder %s1252_s26, 0  ;;  %p1258_p1 = scmp.ne.s32.totalorder %s1255_s19, 0 }
  0x69   : > { %s1144_s0 = sand.u32 (!%p1258_p1), 1, %s933_s13   ;;  %p1259_p13 = scmp.ne.s32.totalorder (!%p1258_p1), %s1249_s22, 0 }
  0x6a   : > { %735 = dma.hbm_to_vmem [thread:$0]  (!%p1257_p5), %s1119_s11, 128, %s200_s9, %s1044_s8  }
  0x6b   : > { %208 = sbr.rel (%p1258_p1) target bundleno = 311 (0x137), region = 32  ;;  %s667_s10 = sshll.u32 (!%p1258_p1), %s1144_s0, 6 }
  0x6c   : > { %s211_s29 = scalar_lea.sflag (!%p1258_p1), [#allocation3], %s1144_s0  ;;  %s1148_s6 = scalar_lea.vmem (!%p1258_p1), [#allocation2], %s667_s10 }
  0x72   : > { %916 = dma.done.wait (%p1259_p13), %s211_s29, 1024  }
  0x73   : > { %918 = vsyncadd (%p1259_p13), %s211_s29, 4294966272  ;;  %s219_s26 = sand.u32 1, %s993_s16   ;;  %s668_s8 = sshll.u32 %s1144_s0, 7 }
  0x74   : > { %s220_s19 = scalar_lea.sflag [#allocation6], %s219_s26  ;;  %s1156_s11 = scalar_lea.vmem [#allocation5], %s668_s8 }
  0x75   : > { %920 = dma.done.wait (%p1259_p13), %s220_s19, 2176  }
  0x76   : > { %922 = vsyncadd (%p1259_p13), %s220_s19, 4294965120  ;;  %v950_v0 = vmov 0   ;;  %v303_v1 = vld [vmem:[%s1156_s11 + $0x20] sm:$0xff]  ;;  %v301_v2 = vld [vmem:[%s1156_s11 + $0x10] sm:$0xff]  ;;  %s669_s22 = sshll.u32 %s1144_s0, 3  ;;  %vm504_vm0 = vcmask 1041409  }
  0x77   : > { %780 = vset.pattern.permute.xlu1 %v950_v0  ;;  %779 = vset.pattern.permute.xlu0 %v950_v0  ;;  %v304_v3 = vld [vmem:[%s1156_s11 + $0x28] sm:$0xff]  ;;  %v302_v4 = vld [vmem:[%s1156_s11 + $0x18] sm:$0xff]  ;;  %v299_v6 = vld [vmem:[%s1156_s11] sm:$0xff]  ;;  %s232_s9 = scalar_lea.vmem [#allocation7], %s669_s22  ;;  %vm507_vm1 = vcmask 1042434   ;;  %vm510_vm2 = vcmask 1043459  }
  0x78   : > { %337 = vperm.xlu1 %780, %v303_v1   ;;  %327 = vperm.xlu0 %779, %v301_v2   ;;  %v300_v5 = vld [vmem:[%s1156_s11 + $0x8] sm:$0xff]  ;;  %v306_v7 = vld [vmem:[%s1156_s11 + $0x38] sm:$0xff]  ;;  %v305_v8 = vld [vmem:[%s1156_s11 + $0x30] sm:$0xff]  ;;  %vm513_vm3 = vcmask 1044484   ;;  %vm516_vm4 = vcmask 1045509   ;;  %s264_s27 = scalar_lea.vmem [#allocation8], %s669_s22 }
  0x79   : > { %v308_v9 = vld [vmem:[%s1156_s11 + $0x48] sm:$0xff]  ;;  %v307_v10 = vld [vmem:[%s1156_s11 + $0x40] sm:$0xff]  ;;  %v310_v11 = vld [vmem:[%s1156_s11 + $0x58] sm:$0xff]  ;;  %s540_s30 = sshll.u32 %s264_s27, 4  ;;  %vm519_vm5 = vcmask 1046534   ;;  %s672_s7 = sshll.u32 %s993_s16, 7  ;;  %s1199_s30 = int_to_ptr.vmem [resolvable:$true] %s540_s30 }
  0x7a   : > { %v309_v12 = vld [vmem:[%s1156_s11 + $0x50] sm:$0xff]  ;;  %v312_v13 = vld [vmem:[%s1156_s11 + $0x68] sm:$0xff]  ;;  %v311_v14 = vld [vmem:[%s1156_s11 + $0x60] sm:$0xff]  ;;  %vm522_vm6 = vcmask 1047559   ;;  %s1197_s25 = scalar_lea.hbm %s1244_s3, %s672_s7  ;;  %s527_s5 = scalar_lea.sflag [#allocation4], %s1144_s0 }
  0x7b   : > { %v314_v15 = vld [vmem:[%s1156_s11 + $0x78] sm:$0xff]  ;;  %v313_v16 = vld [vmem:[%s1156_s11 + $0x70] sm:$0xff]  ;;  %v467_v17 = vld [vmem:[%s232_s9] sm:$0xff]  ;;  %s871_s20 = scalar_lea.vmem %s1199_s30, 128  ;;  %p1260_p7 = scmp.ne.s32.totalorder %s1250_s23, 0 }
  0x7c   : > { %342 = vperm.xlu1 %780, %v304_v3   ;;  %332 = vperm.xlu0 %779, %v302_v4   ;;  %v712_v18 = vld [vmem:[%s1148_s6 + $0x10] sm:$0xff]   ;;  %v711_v19 = vld [vmem:[%s1148_s6 + $0x8] sm:$0xff]   ;;  %v680_v25 = vld [vmem:[%s1148_s6] sm:$0xff]   ;;  %p872_p2 = scmp.ne.s32.totalorder %s1199_s30, %s871_s20  ;;  %s951_s16 = smov [#allocation8]  }
  0x7d   : > { %v689_v22 = vunpack.c.l.bf16 %v712_v18  ;;  %v690_v23 = vunpack.c.h.bf16 %v712_v18  ;;  %v686_v24 = vunpack.c.h.bf16 %v711_v19  ;;  %v685_v26 = vunpack.c.l.bf16 %v711_v19  ;;  %v713_v35 = vld [vmem:[%s1148_s6 + $0x18] sm:$0xff]   ;;  %v714_v44 = vld [vmem:[%s1148_s6 + $0x20] sm:$0xff]   ;;  %v715_v54 = vld [vmem:[%s1148_s6 + $0x28] sm:$0xff]   ;;  %s875_s28 = sshll.u32 %s951_s16, 4  ;;  %s876_s28 = int_to_ptr.vmem [resolvable:$false] %s875_s28 }
  0x7e   : > { %v682_v29 = vunpack.c.h.bf16 %v680_v25  ;;  %v681_v33 = vunpack.c.l.bf16 %v680_v25  ;;  %v694_v42 = vunpack.c.h.bf16 %v713_v35  ;;  %v693_v43 = vunpack.c.l.bf16 %v713_v35  ;;  %v716_v2 = vld [vmem:[%s1148_s6 + $0x30] sm:$0xff]   ;;  %p873_p9 = pnand %p872_p2, %p1260_p7  ;;  %s877_s10 = scalar_lea.vmem %s876_s28, 256 }
  0x7f   : > { %v698_v51 = vunpack.c.h.bf16 %v714_v44  ;;  %v697_v53 = vunpack.c.l.bf16 %v714_v44  ;;  %v702_v62 = vunpack.c.h.bf16 %v715_v54  ;;  %v701_v63 = vunpack.c.l.bf16 %v715_v54  ;;  %p878_p12 = scmp.lt.s32.totalorder %s1199_s30, %s876_s28  ;;  %p879_p0 = scmp.lt.s32.totalorder %s877_s10, %s871_s20 }
  0x80   : > { %322 = vperm.xlu1 %780, %v300_v5   ;;  %317 = vperm.xlu0 %779, %v299_v6   ;;  %p874_p6 = pneg %p873_p9 }
  0x81   : > { %p880_p8 = por %p879_p0, %p878_p12 }
  0x83   : > { %p881_p10 = pnand %p880_p8, %p874_p6 }
  0x84   : > { %352 = vperm.xlu1 %780, %v306_v7   ;;  %347 = vperm.xlu0 %779, %v305_v8  }
  0x88   : > { %362 = vperm.xlu1 %780, %v308_v9   ;;  %357 = vperm.xlu0 %779, %v307_v10   ;;  %v717_v10 = vld [vmem:[%s1148_s6 + $0x38] sm:$0xff]  }
  0x89   : > { %v710_v18 = vunpack.c.h.bf16 %v717_v10 }
  0x8c   : > { %372 = vperm.xlu1 %780, %v310_v11   ;;  %367 = vperm.xlu0 %779, %v309_v12  }
  0x90   : > { %382 = vperm.xlu1 %780, %v312_v13   ;;  %377 = vperm.xlu0 %779, %v311_v14   ;;  %v706_v13 = vunpack.c.h.bf16 %v716_v2  ;;  %v705_v14 = vunpack.c.l.bf16 %v716_v2 }
  0x94   : > { %392 = vperm.xlu1 %780, %v314_v15   ;;  %387 = vperm.xlu0 %779, %v313_v16  }
  0x98   : > { %470 = vperm.xlu0 %779, %v467_v17  }
  0xf7   : > { %v338_v20 = vpop.permute.xlu1 %337  ;;  %v328_v21 = vpop.permute.xlu0 %327 }
  0xf8   : > { %v399_v30 = vmul.f32 %v689_v22, %v338_v20  ;;  %v397_v34 = vmul.f32 %v685_v26, %v328_v21 }
  0xfb   : > { %v343_v27 = vpop.permute.xlu1 %342  ;;  %v333_v28 = vpop.permute.xlu0 %332 }
  0xfc   : > { %v400_v31 = vmul.f32 %v690_v23, %v343_v27  ;;  %v398_v32 = vmul.f32 %v686_v24, %v333_v28  ;;  %v709_v28 = vunpack.c.l.bf16 %v717_v10 }
  0xfe   : > { %v425_v36 = vadd.f32 %v400_v31, %v399_v30  ;;  %v418_v37 = vadd.f32 %v398_v32, %v397_v34 }
  0xff   : > { %v323_v38 = vpop.permute.xlu1 %322  ;;  %v318_v39 = vpop.permute.xlu0 %317 }
 0x100   : > { %v396_v40 = vmul.f32 %v682_v29, %v323_v38  ;;  %v395_v41 = vmul.f32 %v681_v33, %v318_v39  ;;  %v426_v45 = vrot.slane %v425_v36, 4  ;;  %v419_v46 = vrot.slane %v418_v37, 4 }
 0x102   : > { %v411_v47 = vadd.f32 %v396_v40, %v395_v41  ;;  %v427_v55 = vadd.f32 %v426_v45, %v425_v36  ;;  %v420_v56 = vadd.f32 %v419_v46, %v418_v37 }
 0x103   : > { %v353_v48 = vpop.permute.xlu1 %352  ;;  %v348_v49 = vpop.permute.xlu0 %347 }
 0x104   : > { %v402_v50 = vmul.f32 %v694_v42, %v353_v48  ;;  %v401_v52 = vmul.f32 %v693_v43, %v348_v49  ;;  %v412_v57 = vrot.slane %v411_v47, 4  ;;  %v428_v3 = vrot.slane %v427_v55, 2 }
 0x105   : > { %v421_v4 = vrot.slane %v420_v56, 2 }
 0x106   : > { %v432_v58 = vadd.f32 %v402_v50, %v401_v52  ;;  %v413_v5 = vadd.f32 %v412_v57, %v411_v47  ;;  %v429_v19 = vadd.f32 %v428_v3, %v427_v55 }
 0x107   : > { %v363_v59 = vpop.permute.xlu1 %362  ;;  %v358_v60 = vpop.permute.xlu0 %357  ;;  %v422_v20 = vadd.f32 %v421_v4, %v420_v56 }
 0x108   : > { %v404_v61 = vmul.f32 %v698_v51, %v363_v59  ;;  %v433_v0 = vrot.slane %v432_v58, 4  ;;  %v403_v1 = vmul.f32 %v697_v53, %v358_v60  ;;  %v414_v21 = vrot.slane %v413_v5, 2 }
 0x109   : > { %v430_v33 = vrot.slane %v429_v19, 1  ;;  %v423_v34 = vrot.slane %v422_v20, 1 }
 0x10a   : > { %v434_v6 = vadd.f32 %v433_v0, %v432_v58  ;;  %v439_v7 = vadd.f32 %v404_v61, %v403_v1  ;;  %v415_v35 = vadd.f32 %v414_v21, %v413_v5 }
 0x10b   : > { %v373_v8 = vpop.permute.xlu1 %372  ;;  %v368_v9 = vpop.permute.xlu0 %367  ;;  %v431_v48 = vadd.f32 %v430_v33, %v429_v19  ;;  %v424_v49 = vadd.f32 %v423_v34, %v422_v20 }
 0x10c   : > { %v406_v11 = vmul.f32 %v702_v62, %v373_v8  ;;  %v405_v12 = vmul.f32 %v701_v63, %v368_v9  ;;  %v435_v15 = vrot.slane %v434_v6, 2  ;;  %v440_v16 = vrot.slane %v439_v7, 4 }
 0x10d   : > { %v416_v50 = vrot.slane %v415_v35, 1 }
 0x10e   : > { %v446_v17 = vadd.f32 %v406_v11, %v405_v12  ;;  %v441_v22 = vadd.f32 %v440_v16, %v439_v7  ;;  %v436_v29 = vadd.f32 %v435_v15, %v434_v6 }
 0x10f   : > { %v383_v23 = vpop.permute.xlu1 %382  ;;  %v378_v24 = vpop.permute.xlu0 %377  ;;  %v417_v0 = vadd.f32 %v416_v50, %v415_v35 }
 0x110   : > { %v447_v25 = vrot.slane %v446_v17, 4  ;;  %v408_v26 = vmul.f32 %v706_v13, %v383_v23  ;;  %v407_v27 = vmul.f32 %v705_v14, %v378_v24  ;;  %v442_v30 = vrot.slane %v441_v22, 2 }
 0x111   : > { %v437_v43 = vrot.slane %v436_v29, 1 }
 0x112   : > { %v448_v31 = vadd.f32 %v447_v25, %v446_v17  ;;  %v453_v32 = vadd.f32 %v408_v26, %v407_v27  ;;  %v443_v36 = vadd.f32 %v442_v30, %v441_v22 }
 0x113   : > { %v393_v37 = vpop.permute.xlu1 %392  ;;  %v388_v38 = vpop.permute.xlu0 %387  ;;  %v438_v56 = vadd.f32 %v437_v43, %v436_v29 }
 0x114   : > { %v449_v39 = vrot.slane %v448_v31, 2  ;;  %v454_v40 = vrot.slane %v453_v32, 4  ;;  %v410_v41 = vmul.f32 %v710_v18, %v393_v37  ;;  %v409_v42 = vmul.f32 %v709_v28, %v388_v38 }
 0x115   : > { %v444_v44 = vrot.slane %v443_v36, 1 }
 0x116   : > { %v450_v45 = vadd.f32 %v449_v39, %v448_v31  ;;  %v455_v46 = vadd.f32 %v454_v40, %v453_v32  ;;  %v460_v47 = vadd.f32 %v410_v41, %v409_v42 }
 0x117   : > { %v471_v51 = vpop.permute.xlu0 %470  ;;  %v445_v60 = vadd.f32 %v444_v44, %v443_v36 }
 0x118   : > { %v451_v52 = vrot.slane %v450_v45, 1  ;;  %v456_v53 = vrot.slane %v455_v46, 2  ;;  %v461_v54 = vrot.slane %v460_v47, 4  ;;  %v472_v55 = vrot.slane %v471_v51, 1 }
 0x119   : > { %v473_v57 = vrot.slane %v471_v51, 2  ;;  %v474_v58 = vrot.slane %v471_v51, 3  ;;  %v475_v59 = vrot.slane %v471_v51, 4  ;;  %v476_v6 = vrot.slane %v471_v51, 5 }
 0x11a   : > { %v452_v61 = vadd.f32 %v451_v52, %v450_v45  ;;  %v457_v62 = vadd.f32 %v456_v53, %v455_v46  ;;  %v462_v63 = vadd.f32 %v461_v54, %v460_v47  ;;  %v488_v1 = vmul.f32 %v472_v55, %v424_v49 }
 0x11b   : > { %v489_v2 = vmul.f32 %v473_v57, %v431_v48  ;;  %v490_v3 = vmul.f32 %v474_v58, %v438_v56  ;;  %v491_v7 = vmul.f32 %v475_v59, %v445_v60  ;;  %v487_v8 = vmul.f32 %v471_v51, %v417_v0 }
 0x11c   : > { %v458_v4 = vrot.slane %v457_v62, 1  ;;  %v463_v5 = vrot.slane %v462_v63, 2  ;;  %v503_v9 = vrot.slane %v488_v1, 7  ;;  %v477_v13 = vrot.slane %v471_v51, 6 }
 0x11d   : > { %v506_v10 = vrot.slane %v489_v2, 6  ;;  %v492_v14 = vmul.f32 %v476_v6, %v452_v61  ;;  %v509_v16 = vrot.slane %v490_v3, 5  ;;  %v512_v18 = vrot.slane %v491_v7, 4 }
 0x11e   : > { %v459_v11 = vadd.f32 %v458_v4, %v457_v62  ;;  %v464_v12 = vadd.f32 %v463_v5, %v462_v63  ;;  %v505_v15 = vsel %vm504_vm0, %v503_v9, %v487_v8  ;;  %v478_v23 = vrot.slane %v471_v51, 7 }
 0x11f   : > { %v508_v20 = vsel %vm507_vm1, %v506_v10, %v505_v15  ;;  %v515_v25 = vrot.slane %v492_v14, 3 }
 0x120   : > { %v465_v17 = vrot.slane %v464_v12, 1  ;;  %v493_v19 = vmul.f32 %v477_v13, %v459_v11  ;;  %v511_v21 = vsel %vm510_vm2, %v509_v16, %v508_v20 }
 0x121   : > { %v514_v24 = vsel %vm513_vm3, %v512_v18, %v511_v21 }
 0x122   : > { %v466_v22 = vadd.f32 %v465_v17, %v464_v12  ;;  %v518_v26 = vrot.slane %v493_v19, 2  ;;  %v517_v28 = vsel %vm516_vm4, %v515_v25, %v514_v24 }
 0x124   : > { %v494_v27 = vmul.f32 %v478_v23, %v466_v22  ;;  %v520_v30 = vsel %vm519_vm5, %v518_v26, %v517_v28 }
 0x126   : > { %v521_v29 = vrot.slane %v494_v27, 1 }
 0x128   : > { %v523_v31 = vsel %vm522_vm6, %v521_v29, %v520_v30 }
 0x129   : > { %525 = vst [vmem:[%s264_s27] sm:$0xff] %v523_v31 }
 0x12a   : > { %884 = shalt.err (!%p881_p10)
}
 0x12b   : > { %s885_s0 = scalar_lea.hbm %s1197_s25, 128  ;;  %s889_s26 = scalar_lea.hbm %s1244_s3, 256 }
 0x12c   : > { %p886_p11 = scmp.ne.s32.totalorder %s1197_s25, %s885_s0  ;;  %p890_p5 = scmp.lt.u32.totalorder %s1197_s25, %s1244_s3 }
 0x12d   : > { %p891_p1 = scmp.lt.u32.totalorder %s889_s26, %s885_s0  ;;  %p893_p2 = scmp.lt.u32.totalorder %s885_s0, %s1197_s25 }
 0x12e   : > { %p887_p4 = pnand %p886_p11, %p1260_p7 }
 0x12f   : > { %p892_p13 = por %p891_p1, %p890_p5 }
 0x130   : > { %p888_p3 = pneg %p887_p4 }
 0x131   : > { %p894_p9 = por %p893_p2, %p892_p13 }
 0x133   : > { %p895_p6 = pnand %p894_p9, %p888_p3 }
 0x135   : > { %898 = shalt.err (!%p895_p6)
}
 0x136   : > { %724 = dma.vmem_to_hbm [thread:$0]  (%p1260_p7), %s1199_s30, 128, %s1197_s25, %s527_s5  }
 0x137 PF: > { %s552_s11 = sand.u32 1, %s929_s12   ;;  %p1261_p12 = scmp.ne.s32.totalorder %s1251_s24, 0 }
 0x138   : > { %p1262_p0 = scmp.ge.s32.totalorder %s941_s15, 2  ;;  %s553_s22 = scalar_lea.sflag [#allocation4], %s552_s11 }
 0x13a   : > { %p737_p8 = pnand %p1262_p0, %p1261_p12 }
 0x13c   : > { %924 = dma.done.wait (!%p737_p8), %s553_s22, 128  }
 0x13d   : > { %926 = vsyncadd (!%p737_p8), %s553_s22, 4294967168  ;;  %p19_p10 = scmp.ge.s32.totalorder %s997_s18, 4   ;;  %s1263_s12 = smov %s933_s13 }
 0x13e   : > { %s1264_s13 = smov %s937_s14  ;;  %s1265_s14 = smov %s1009_s21 }
 0x13f   : > { %s1266_s15 = smov %s997_s18  ;;  %21 = sbr.rel (!%p19_p10) target bundleno = 9 (0x9), region = 101 }
 0x146   :  { %558 = vsyncpa [#allocation3], 1 }
 0x147   :  { %560 = vsyncpa [#allocation3 + $0x1], 1 }
 0x148   :  { %561 = vsyncpa [#allocation6], 1 }
 0x149   :  { %563 = vsyncpa [#allocation6 + $0x1], 1 }
 0x14a   :  { %564 = vsyncpa [#allocation4], 1 }
 0x14b   :  { %566 = vsyncpa [#allocation4 + $0x1], 1 }

</bundles_post_ra>
